<compile_context>
chip_gen: v6e
topology: v6e:2x2x1
jax: 0.10.0
libtpu: 0.0.40
codegen_flags: <defaults>
</compile_context>

<pallas_src>
from functools import partial

import jax
import jax.numpy as jnp
from jax.experimental import pallas as pl
from jax.experimental.pallas import tpu as pltpu


def _round_up(x, m):
    return ((x + m - 1) // m) * m


def _extra_cond_net_kernel(xT_ref, w1t_ref, b1_ref, w2t_ref, b2_ref, out_ref,
                           *, transpose_out):
    # xT_ref : (F, TB) f32    w1t_ref: (H, F) f32     b1_ref: (H, 1) f32
    # w2t_ref: (O, H)  bf16   b2_ref : (O, 1) f32
    # out_ref: (TB, O) if transpose_out else (O, TB)
    F = xT_ref.shape[0]

    x = xT_ref[...]                                            # (F, TB) f32

    if F <= 8:
        # Tiny contraction dim -> unrolled VPU FMAs; keep the MXU free.
        # Implicit (H,1)*(1,TB) broadcasting, no materialized broadcast_to.
        w1 = w1t_ref[...]                                      # (H, F) f32
        acc = w1[:, 0:1] * x[0:1, :]                           # (H, TB)
        for f in range(1, F):
            acc = acc + w1[:, f:f + 1] * x[f:f + 1, :]
        h = jnp.maximum(acc + b1_ref[...], 0.0)                # (H, TB) f32
    else:
        h = jnp.dot(w1t_ref[...], x,
                    preferred_element_type=jnp.float32) + b1_ref[...]
        h = jnp.maximum(h, 0.0)

    # Layer 2 on the MXU: bf16 inputs, f32 accumulation, lane-dense result.
    y = jnp.dot(w2t_ref[...], h.astype(w2t_ref.dtype),
                preferred_element_type=jnp.float32) + b2_ref[...]   # (O, TB)

    if transpose_out:
        out_ref[...] = y.T.astype(out_ref.dtype)               # (TB, O) stores
    else:
        out_ref[...] = y.astype(out_ref.dtype)                 # (O, TB) stores


def _choose_tiling(B, block_b):
    """Adaptive batch tile: few grid steps, small padding, >=2 steps when big."""
    B128 = _round_up(max(B, 1), 128)
    cap = _round_up(max(block_b, 128), 128)
    if B128 <= cap:
        return B128, B128, 1                      # TB, B_pad, steps
    steps = pl.cdiv(B128, cap)                    # >= 2 -> megacore-shardable
    TB = _round_up(pl.cdiv(B128, steps), 128)
    steps = pl.cdiv(B128, TB)
    return TB, steps * TB, steps


def extra_cond_net(x, w1, b1, w2, b2, *, block_b=8192,
                   out_dtype=jnp.float32, mxu_dtype=jnp.bfloat16,
                   return_transposed=False):
    """x: (B, F) f32.  Weights stored as (in, out) (transpose of nn.Linear).

    Returns (B, O) in out_dtype, or the lane-dense (O, B) layout if
    return_transposed=True (no in-kernel transpose; for fusing consumers).
    """
    B, F = x.shape
    H = w1.shape[1]
    O = w2.shape[1]

    TB, B_pad, steps = _choose_tiling(B, block_b)

    # Lane-dense f32 input; only the MXU operand (w2) is cast to bf16.
    xT = x.T.astype(jnp.float32)                              # (F, B)
    if B_pad != B:
        xT = jnp.pad(xT, ((0, 0), (0, B_pad - B)))            # (F, B_pad)
    w1t = w1.T.astype(jnp.float32)                            # (H, F)
    w2t = w2.T.astype(mxu_dtype)                              # (O, H)
    b1c = b1.reshape(H, 1).astype(jnp.float32)
    b2c = b2.reshape(O, 1).astype(jnp.float32)

    out_item = jnp.dtype(out_dtype).itemsize
    cost = pl.CostEstimate(
        flops=2 * B_pad * (F * H + H * O),
        transcendentals=0,
        bytes_accessed=(xT.size * 4 + w1t.size * 4
                        + w2t.size * jnp.dtype(mxu_dtype).itemsize
                        + (H + O) * 4 + B_pad * O * out_item),
    )

    # Rough per-batch-element VMEM need (double-buffered streams + scratch);
    # raise the scoped limit so large tiles also compile on v5e (16 MiB default).
    bytes_per_elem = (2 * F * 4                 # x tile, double-buffered
                      + 2 * O * out_item        # out tile, double-buffered
                      + H * 4 + H * 2           # h f32 + bf16 copy
                      + 2 * O * 4)              # y f32 + transpose temp
    vmem_limit = int(max(32 * 1024 * 1024, 2 * bytes_per_elem * TB))

    if return_transposed:
        out_shape = jax.ShapeDtypeStruct((O, B_pad), out_dtype)
        out_spec = pl.BlockSpec((O, TB), lambda i: (0, i))
    else:
        out_shape = jax.ShapeDtypeStruct((B_pad, O), out_dtype)
        out_spec = pl.BlockSpec((TB, O), lambda i: (i, 0))

    y = pl.pallas_call(
        partial(_extra_cond_net_kernel, transpose_out=not return_transposed),
        out_shape=out_shape,
        grid_spec=pltpu.PrefetchScalarGridSpec(
            num_scalar_prefetch=0,
            grid=(steps,),
            in_specs=[
                pl.BlockSpec((F, TB), lambda i: (0, i)),   # x streams over batch
                pl.BlockSpec((H, F), lambda i: (0, 0)),    # weights stay resident
                pl.BlockSpec((H, 1), lambda i: (0, 0)),
                pl.BlockSpec((O, H), lambda i: (0, 0)),
                pl.BlockSpec((O, 1), lambda i: (0, 0)),
            ],
            out_specs=out_spec,
        ),
        compiler_params=pltpu.CompilerParams(
            dimension_semantics=("parallel",),             # megacore shard on v7x
            vmem_limit_bytes=vmem_limit,
        ),
        cost_estimate=cost,
    )(xT, w1t, b1c, w2t, b2c)

    if return_transposed:
        return y[:, :B]                                    # (O, B)
    return y[:B]                                           # (B, O)


def init_params(key, n_features, hidden_dim=64, output_dim=32):
    """Deterministic init mimicking nn.Linear default (uniform +/- 1/sqrt(fan_in)).
    Weights are stored as (in, out), i.e. transpose of PyTorch's (out, in)."""
    k1, k2, k3, k4 = jax.random.split(key, 4)
    bound1 = 1.0 / jnp.sqrt(jnp.float32(n_features))
    bound2 = 1.0 / jnp.sqrt(jnp.float32(hidden_dim))
    w1 = jax.random.uniform(k1, (n_features, hidden_dim), jnp.float32, -bound1, bound1)
    b1 = jax.random.uniform(k2, (hidden_dim,), jnp.float32, -bound1, bound1)
    w2 = jax.random.uniform(k3, (hidden_dim, output_dim), jnp.float32, -bound2, bound2)
    b2 = jax.random.uniform(k4, (output_dim,), jnp.float32, -bound2, bound2)
    return w1, b1, w2, b2


def _reference(x, w1, b1, w2, b2):
    # Mirrors kernel numerics: layer 1 in f32, layer 2 bf16-rounded, f32 acc.
    rd = lambda a: a.astype(jnp.bfloat16).astype(jnp.float32)
    h = jnp.maximum(x @ w1 + b1, 0.0)
    return rd(h) @ rd(w2) + b2


if __name__ == "__main__":
    n_features, hidden_dim, output_dim = 3, 64, 32
    # TODO(synk): at batch ~8 a standalone pallas_call is pure fixed overhead;
    # in production fuse this tiny MLP into its consumer or leave it to XLA.
    key = jax.random.PRNGKey(0)
    kx, kp, kx2 = jax.random.split(key, 3)
    w1, b1, w2, b2 = init_params(kp, n_features, hidden_dim, output_dim)

    # Case 1: tiny batch (single grid step).
    batch = 8
    x = jax.random.normal(kx, (batch, n_features), jnp.float32)
    out = extra_cond_net(x, w1, b1, w2, b2)
    jax.block_until_ready(out)
    assert out.shape == (batch, output_dim)
    ref_bf16 = _reference(x, w1, b1, w2, b2)
    assert jnp.allclose(out, ref_bf16, atol=2e-3, rtol=2e-3), \
        float(jnp.max(jnp.abs(out - ref_bf16)))
    ref_f32 = jnp.maximum(x @ w1 + b1, 0.0) @ w2 + b2
    assert jnp.allclose(out, ref_f32, atol=2e-2, rtol=2e-2)

    # Case 2: non-128-multiple batch over a multi-step grid (forced small tile)
    # to exercise adaptive tiling, padding slice-off, and the in-kernel transpose.
    batch2 = 300
    x2 = jax.random.normal(kx2, (batch2, n_features), jnp.float32)
    out2 = extra_cond_net(x2, w1, b1, w2, b2, block_b=128)
    jax.block_until_ready(out2)
    assert out2.shape == (batch2, output_dim)
    ref2 = _reference(x2, w1, b1, w2, b2)
    assert jnp.allclose(out2, ref2, atol=2e-3, rtol=2e-3), \
        float(jnp.max(jnp.abs(out2 - ref2)))

    print("KERNEL_OK")
</pallas_src>

<mosaic_0001>
module attributes {stable_mosaic.version = 11 : i64} {
  func.func @_extra_cond_net_kernel(%arg0: i32, %arg1: memref<3x128xf32, #tpu.memory_space<vmem>>, %arg2: memref<64x3xf32, #tpu.memory_space<vmem>>, %arg3: memref<64x1xf32, #tpu.memory_space<vmem>>, %arg4: memref<32x64xbf16, #tpu.memory_space<vmem>>, %arg5: memref<32x1xf32, #tpu.memory_space<vmem>>, %arg6: memref<128x32xf32, #tpu.memory_space<vmem>>) attributes {dimension_semantics = [#tpu.dimension_semantics<parallel>], iteration_bounds = array<i64: 1>, scalar_prefetch = 0 : i64, scratch_operands = 0 : i64, tpu.core_type = #tpu.core_type<tc>, window_params = [{transform_indices = @transform_0, window_bounds = array<i64: 3, 128>}, {pipeline_mode = #tpu.pipeline_mode<synchronous>, transform_indices = @transform_1, window_bounds = array<i64: 64, 3>}, {pipeline_mode = #tpu.pipeline_mode<synchronous>, transform_indices = @transform_2, window_bounds = array<i64: 64, 1>}, {pipeline_mode = #tpu.pipeline_mode<synchronous>, transform_indices = @transform_3, window_bounds = array<i64: 32, 64>}, {pipeline_mode = #tpu.pipeline_mode<synchronous>, transform_indices = @transform_4, window_bounds = array<i64: 32, 1>}, {transform_indices = @transform_5, window_bounds = array<i64: 128, 32>}]} {
    %c0 = arith.constant 0 : index
    %c0_0 = arith.constant 0 : index
    %0 = vector.load %arg1[%c0, %c0_0] : memref<3x128xf32, #tpu.memory_space<vmem>>, vector<3x128xf32>
    %c0_1 = arith.constant 0 : index
    %c0_2 = arith.constant 0 : index
    %1 = vector.load %arg2[%c0_1, %c0_2] : memref<64x3xf32, #tpu.memory_space<vmem>>, vector<64x3xf32>
    %2 = vector.extract_strided_slice %1 {offsets = [0, 0], sizes = [64, 1], strides = [1, 1]} : vector<64x3xf32> to vector<64x1xf32>
    %3 = vector.extract_strided_slice %0 {offsets = [0, 0], sizes = [1, 128], strides = [1, 1]} : vector<3x128xf32> to vector<1x128xf32>
    %4 = vector.broadcast %2 : vector<64x1xf32> to vector<64x128xf32>
    %5 = vector.broadcast %3 : vector<1x128xf32> to vector<64x128xf32>
    %6 = arith.mulf %4, %5 : vector<64x128xf32>
    %7 = vector.extract_strided_slice %1 {offsets = [0, 1], sizes = [64, 1], strides = [1, 1]} : vector<64x3xf32> to vector<64x1xf32>
    %8 = vector.extract_strided_slice %0 {offsets = [1, 0], sizes = [1, 128], strides = [1, 1]} : vector<3x128xf32> to vector<1x128xf32>
    %9 = vector.broadcast %7 : vector<64x1xf32> to vector<64x128xf32>
    %10 = vector.broadcast %8 : vector<1x128xf32> to vector<64x128xf32>
    %11 = arith.mulf %9, %10 : vector<64x128xf32>
    %12 = arith.addf %6, %11 : vector<64x128xf32>
    %13 = vector.extract_strided_slice %1 {offsets = [0, 2], sizes = [64, 1], strides = [1, 1]} : vector<64x3xf32> to vector<64x1xf32>
    %14 = vector.extract_strided_slice %0 {offsets = [2, 0], sizes = [1, 128], strides = [1, 1]} : vector<3x128xf32> to vector<1x128xf32>
    %15 = vector.broadcast %13 : vector<64x1xf32> to vector<64x128xf32>
    %16 = vector.broadcast %14 : vector<1x128xf32> to vector<64x128xf32>
    %17 = arith.mulf %15, %16 : vector<64x128xf32>
    %18 = arith.addf %12, %17 : vector<64x128xf32>
    %c0_3 = arith.constant 0 : index
    %c0_4 = arith.constant 0 : index
    %19 = vector.load %arg3[%c0_3, %c0_4] : memref<64x1xf32, #tpu.memory_space<vmem>>, vector<64x1xf32>
    %20 = vector.broadcast %19 : vector<64x1xf32> to vector<64x128xf32>
    %21 = arith.addf %18, %20 : vector<64x128xf32>
    %cst = arith.constant 0.000000e+00 : f32
    %22 = vector.broadcast %cst : f32 to vector<64x128xf32>
    %23 = arith.maximumf %21, %22 : vector<64x128xf32>
    %c0_5 = arith.constant 0 : index
    %c0_6 = arith.constant 0 : index
    %24 = vector.load %arg4[%c0_5, %c0_6] : memref<32x64xbf16, #tpu.memory_space<vmem>>, vector<32x64xbf16>
    %25 = arith.truncf %23 : vector<64x128xf32> to vector<64x128xbf16>
    %cst_7 = arith.constant dense<0.000000e+00> : vector<32x128xf32>
    %26 = tpu.matmul %24, %25, %cst_7 {dimension_numbers = #tpu.dot_dimension_numbers<[1], [0], [0], [1], [0, 0, 1, 1], [], []>} : vector<32x64xbf16>, vector<64x128xbf16>, vector<32x128xf32> -> vector<32x128xf32>
    %c0_8 = arith.constant 0 : index
    %c0_9 = arith.constant 0 : index
    %27 = vector.load %arg5[%c0_8, %c0_9] : memref<32x1xf32, #tpu.memory_space<vmem>>, vector<32x1xf32>
    %28 = vector.broadcast %27 : vector<32x1xf32> to vector<32x128xf32>
    %29 = arith.addf %26, %28 : vector<32x128xf32>
    %30 = tpu.transpose %29, [1, 0] : vector<32x128xf32> -> vector<128x32xf32>
    %c0_10 = arith.constant 0 : index
    %c0_11 = arith.constant 0 : index
    %31 = vector.load %arg6[%c0_10, %c0_11] : memref<128x32xf32, #tpu.memory_space<vmem>>, vector<128x32xf32>
    tpu.vector_store %arg6[%c0_10, %c0_11], %30 {strides = array<i32>} : memref<128x32xf32, #tpu.memory_space<vmem>>, vector<128x32xf32>,
    return
  }
  func.func @transform_0(%arg0: i32) -> (i32, i32) {
    %c0_i32 = arith.constant 0 : i32
    %c0_i32_0 = arith.constant 0 : i32
    return %c0_i32, %arg0 : i32, i32
  }
  func.func @transform_1(%arg0: i32) -> (i32, i32) {
    %c0_i32 = arith.constant 0 : i32
    %c0_i32_0 = arith.constant 0 : i32
    %c0_i32_1 = arith.constant 0 : i32
    return %c0_i32, %c0_i32_0 : i32, i32
  }
  func.func @transform_2(%arg0: i32) -> (i32, i32) {
    %c0_i32 = arith.constant 0 : i32
    %c0_i32_0 = arith.constant 0 : i32
    %c0_i32_1 = arith.constant 0 : i32
    return %c0_i32, %c0_i32_0 : i32, i32
  }
  func.func @transform_3(%arg0: i32) -> (i32, i32) {
    %c0_i32 = arith.constant 0 : i32
    %c0_i32_0 = arith.constant 0 : i32
    %c0_i32_1 = arith.constant 0 : i32
    return %c0_i32, %c0_i32_0 : i32, i32
  }
  func.func @transform_4(%arg0: i32) -> (i32, i32) {
    %c0_i32 = arith.constant 0 : i32
    %c0_i32_0 = arith.constant 0 : i32
    %c0_i32_1 = arith.constant 0 : i32
    return %c0_i32, %c0_i32_0 : i32, i32
  }
  func.func @transform_5(%arg0: i32) -> (i32, i32) {
    %c0_i32 = arith.constant 0 : i32
    %c0_i32_0 = arith.constant 0 : i32
    return %arg0, %c0_i32 : i32, i32
  }
}

</mosaic_0001>

<bundles_post_ra>
// kernel: tpu_custom_call.1
= control target key start
LH: loop header
LB: loop body
LE: loop exit
PB: predicated region body
PF: predicated region fallthrough
CT: control target
= control target key end

     0   :  { %v444_v0 = vmov 2   ;;  %v445_v1 = vmov 1   ;;  %v446_v7 = vmov 0   ;;  %vm292_vm0 = vcmask 523264   ;;  %s653_s1 = inlined_call_operand.vmem [shape: f32[64,3], index: 1, kind: input, shape index: {}]   ;;  %s654_s2 = inlined_call_operand.vmem [shape: f32[64,1], index: 2, kind: input, shape index: {}]   ;;  %s655_s4 = inlined_call_operand.vmem [shape: f32[32,1], index: 4, kind: input, shape index: {}]   ;;  %s656_s3 = inlined_call_operand.vmem [shape: bf16[32,64], index: 3, kind: input, shape index: {}]   ;;  %s657_s0 = inlined_call_operand.vmem [shape: f32[3,128], index: 0, kind: input, shape index: {}]   ;;  %s658_s5 = inlined_call_operand.vmem [shape: f32[128,32], index: 5, kind: output, shape index: {}]  }
   0x1   :  { %428 = vset.pattern.permute.xlu0 %v444_v0  ;;  %427 = vset.pattern.permute.xlu1 %v445_v1  ;;  %v28_v2 = vld [vmem:[%s653_s1 + $0x30] sm:$0xff]  ;;  %v29_v3 = vld [vmem:[%s653_s1 + $0x38] sm:$0xff]  ;;  %v26_v4 = vld [vmem:[%s653_s1 + $0x20] sm:$0xff]  ;;  %v70_v30 = vlaneseq  ;;  %vm380_vm1 = vcmask 261120  }
   0x2   :  { %159 = vperm.xlu0 %428, %v28_v2   ;;  %107 = vperm.xlu1 %427, %v28_v2   ;;  %v25_v5 = vld [vmem:[%s653_s1 + $0x18] sm:$0xff]  ;;  %v24_v6 = vld [vmem:[%s653_s1 + $0x10] sm:$0xff]  ;;  %v23_v8 = vld [vmem:[%s653_s1 + $0x8] sm:$0xff] }
   0x3   :  { %v27_v9 = vld [vmem:[%s653_s1 + $0x28] sm:$0xff]  ;;  %v192_v10 = vld [vmem:[%s654_s2 + $0x30] sm:$0xff]  ;;  %v193_v11 = vld [vmem:[%s654_s2 + $0x38] sm:$0xff]  ;;  %v71_v32 = vshrl.u32 %v70_v30, 7 }
   0x4   :  { %v22_v12 = vld [vmem:[%s653_s1] sm:$0xff]  ;;  %v188_v13 = vld [vmem:[%s654_s2 + $0x10] sm:$0xff]  ;;  %v187_v14 = vld [vmem:[%s654_s2 + $0x8] sm:$0xff] }
   0x5   :  { %v259_v15 = vld [vmem:[%s655_s4 + $0x8] sm:$0xff]  ;;  %v261_v16 = vld [vmem:[%s655_s4 + $0x18] sm:$0xff]  ;;  %v190_v17 = vld [vmem:[%s654_s2 + $0x20] sm:$0xff]  ;;  %v116_v35 = vsub.s32 1, %v71_v32  ;;  %v72_v36 = vsub.s32 0, %v71_v32  ;;  %v168_v40 = vsub.s32 2, %v71_v32 }
   0x6   :  { %111 = vperm.xlu1 %427, %v29_v3   ;;  %151 = vperm.xlu0 %428, %v26_v4   ;;  %v191_v18 = vld [vmem:[%s654_s2 + $0x28] sm:$0xff]  ;;  %v189_v19 = vld [vmem:[%s654_s2 + $0x18] sm:$0xff]  ;;  %v186_v20 = vld [vmem:[%s654_s2] sm:$0xff] }
   0x7   :  { %v258_v21 = vld [vmem:[%s655_s4] sm:$0xff]  ;;  %v260_v23 = vld [vmem:[%s655_s4 + $0x10] sm:$0xff] }
   0x8   :  { %v442_v22 = vld [vmem:[%s656_s3] sm:$0xff]  }
   0x9   :  { %419 = vmatprep.mubr.msk.bf16.mxu0 %vm292_vm0, %v442_v22  ;;  %v21_v37 = vld [vmem:[%s657_s0] sm:$0x7] }
   0xa   :  { %429 = vset.pattern.permute.xlu1 %v444_v0  ;;  %147 = vperm.xlu0 %428, %v25_v5   ;;  %v553_v39 = vrot.slane %v21_v37, %v116_v35  ;;  %v555_v41 = vrot.slane %v21_v37, %v72_v36  ;;  %v559_v46 = vrot.slane %v21_v37, %v168_v40 }
   0xb   :  { %163 = vperm.xlu1 %429, %v29_v3  }
   0xe   :  { %436 = vset.pattern.permute.xlu0 %v445_v1 }
   0xf   :  { %430 = vset.pattern.permute.xlu1 %v446_v7  ;;  %91 = vperm.xlu0 %436, %v24_v6  }
  0x10   :  { %52 = vperm.xlu1 %430, %v26_v4  }
  0x13   :  { %87 = vperm.xlu0 %436, %v23_v8  }
  0x14   :  { %431 = vset.pattern.permute.xlu1 %v445_v1 }
  0x15   :  { %99 = vperm.xlu1 %431, %v26_v4  }
  0x17   :  { %439 = vset.pattern.permute.xlu0 %v446_v7 }
  0x18   :  { %62 = vperm.xlu0 %439, %v28_v2  }
  0x19   :  { %103 = vperm.xlu1 %431, %v27_v9  }
  0x1c   :  { %67 = vperm.xlu0 %439, %v29_v3  }
  0x1d   :  { %432 = vset.pattern.permute.xlu1 %v444_v0 }
  0x1e   :  { %155 = vperm.xlu1 %432, %v27_v9  }
  0x20   :  { %57 = vperm.xlu0 %439, %v27_v9  }
  0x22   :  { %433 = vset.pattern.permute.xlu1 %v446_v7 }
  0x23   :  { %226 = vperm.xlu1 %433, %v192_v10  }
  0x24   :  { %231 = vperm.xlu0 %439, %v193_v11  }
  0x27   :  { %42 = vperm.xlu1 %433, %v24_v6  }
  0x28   :  { %32 = vperm.xlu0 %439, %v22_v12  }
  0x2b   :  { %47 = vperm.xlu1 %433, %v25_v5  }
  0x2c   :  { %206 = vperm.xlu0 %439, %v188_v13  }
  0x2f   :  { %434 = vset.pattern.permute.xlu1 %v445_v1 }
  0x30   :  { %95 = vperm.xlu1 %434, %v25_v5   ;;  %201 = vperm.xlu0 %439, %v187_v14  }
  0x34   :  { %435 = vset.pattern.permute.xlu1 %v444_v0  ;;  %269 = vperm.xlu0 %439, %v259_v15  }
  0x35   :  { %143 = vperm.xlu1 %435, %v24_v6  }
  0x38   :  { %279 = vperm.xlu0 %439, %v261_v16  }
  0x39   :  { %437 = vset.pattern.permute.xlu1 %v446_v7 }
  0x3a   :  { %216 = vperm.xlu1 %437, %v190_v17  }
  0x3e   :  { %221 = vperm.xlu1 %437, %v191_v18  }
  0x42   :  { %37 = vperm.xlu1 %437, %v23_v8  }
  0x46   :  { %438 = vset.pattern.permute.xlu1 %v445_v1 }
  0x47   :  { %83 = vperm.xlu1 %438, %v22_v12  }
  0x4b   :  { %440 = vset.pattern.permute.xlu1 %v444_v0 }
  0x4c   :  { %135 = vperm.xlu1 %440, %v22_v12  }
  0x50   :  { %139 = vperm.xlu1 %440, %v23_v8  }
  0x54   :  { %441 = vset.pattern.permute.xlu1 %v446_v7 }
  0x55   :  { %211 = vperm.xlu1 %441, %v189_v19  }
  0x59   :  { %196 = vperm.xlu1 %441, %v186_v20  }
  0x5d   :  { %264 = vperm.xlu1 %441, %v258_v21  }
  0x61   :  { %274 = vperm.xlu1 %441, %v260_v23  }
  0x7d   :  { %v108_v24 = vpop.permute.xlu1 %107  ;;  %v160_v25 = vpop.permute.xlu0 %159 }
  0x7e   :  { %v124_v45 = vmul.f32 %v553_v39, %v108_v24  ;;  %v176_v50 = vmul.f32 %v559_v46, %v160_v25 }
  0x81   :  { %v112_v26 = vpop.permute.xlu1 %111  ;;  %v152_v27 = vpop.permute.xlu0 %151 }
  0x82   :  { %v125_v48 = vmul.f32 %v553_v39, %v112_v26  ;;  %v174_v8 = vmul.f32 %v559_v46, %v152_v27 }
  0x85   :  { %v546_v28 = vpop.permute.xlu0 %147 }
  0x86   :  { %v164_v29 = vpop.permute.xlu1 %163 }
  0x87   :  { %v177_v55 = vmul.f32 %v559_v46, %v164_v29 }
  0x8a   :  { %v92_v31 = vpop.permute.xlu0 %91 }
  0x8b   :  { %v53_v33 = vpop.permute.xlu1 %52  ;;  %v120_v24 = vmul.f32 %v553_v39, %v92_v31 }
  0x8c   :  { %v78_v5 = vmul.f32 %v555_v41, %v53_v33 }
  0x8e   :  { %v548_v34 = vpop.permute.xlu0 %87 }
  0x8f   :  { %v119_v36 = vmul.f32 %v553_v39, %v548_v34 }
  0x90   :  { %v100_v38 = vpop.permute.xlu1 %99 }
  0x91   :  { %v122_v4 = vmul.f32 %v553_v39, %v100_v38 }
  0x93   :  { %v63_v42 = vpop.permute.xlu0 %62  ;;  %v130_v9 = vadd.f32 %v122_v4, %v78_v5 }
  0x94   :  { %v104_v43 = vpop.permute.xlu1 %103  ;;  %v80_v44 = vmul.f32 %v555_v41, %v63_v42 }
  0x95   :  { %v123_v10 = vmul.f32 %v553_v39, %v104_v43  ;;  %v182_v14 = vadd.f32 %v174_v8, %v130_v9  ;;  %v173_v43 = vmul.f32 %v559_v46, %v546_v28 }
  0x96   :  { %v132_v51 = vadd.f32 %v124_v45, %v80_v44 }
  0x97   :  { %v68_v47 = vpop.permute.xlu0 %67 }
  0x98   :  { %v81_v49 = vmul.f32 %v555_v41, %v68_v47  ;;  %v184_v56 = vadd.f32 %v176_v50, %v132_v51 }
  0x99   :  { %v156_v52 = vpop.permute.xlu1 %155 }
  0x9a   :  { %v133_v53 = vadd.f32 %v125_v48, %v81_v49  ;;  %v175_v13 = vmul.f32 %v559_v46, %v156_v52 }
  0x9b   :  { %v58_v54 = vpop.permute.xlu0 %57 }
  0x9c   :  { %v185_v58 = vadd.f32 %v177_v55, %v133_v53  ;;  %v79_v6 = vmul.f32 %v555_v41, %v58_v54 }
  0x9e   :  { %v227_v57 = vpop.permute.xlu1 %226  ;;  %v131_v11 = vadd.f32 %v123_v10, %v79_v6 }
  0x9f   :  { %v240_v59 = vadd.f32 %v227_v57, %v184_v56  ;;  %v232_v60 = vpop.permute.xlu0 %231 }
  0xa0   :  { %v241_v61 = vadd.f32 %v232_v60, %v185_v58  ;;  %v183_v16 = vadd.f32 %v175_v13, %v131_v11 }
  0xa1   :  { %v248_v62 = vmax.f32 %v240_v59, 0.0 }
  0xa2   :  { %v249_v63 = vmax.f32 %v241_v61, 0.0  ;;  %v43_v0 = vpop.permute.xlu1 %42 }
  0xa3   :  { %v76_v25 = vmul.f32 %v555_v41, %v43_v0  ;;  %v33_v26 = vpop.permute.xlu0 %32 }
  0xa4   :  { %v257_v1 = vpack.c.bf16 %v249_v63, %v248_v62  ;;  %v74_v47 = vmul.f32 %v555_v41, %v33_v26 }
  0xa5   :  { %v128_v32 = vadd.f32 %v120_v24, %v76_v25 }
  0xa6   :  { %v48_v2 = vpop.permute.xlu1 %47  ;;  %411 = vmatprep.subr.bf16.mxu0 %v257_v1 }
  0xa7   :  { %412 = vmatpush3.bf16.msra.mxu0 %v257_v1  ;;  %v77_v33 = vmul.f32 %v555_v41, %v48_v2  ;;  %v207_v31 = vpop.permute.xlu0 %206 }
  0xab   :  { %v96_v3 = vpop.permute.xlu1 %95  ;;  %v202_v54 = vpop.permute.xlu0 %201 }
  0xac   :  { %v121_v27 = vmul.f32 %v553_v39, %v96_v3 }
  0xae   :  { %v129_v37 = vadd.f32 %v121_v27, %v77_v33 }
  0xaf   :  { %v270_v3 = vpop.permute.xlu0 %269 }
  0xb0   :  { %v144_v7 = vpop.permute.xlu1 %143  ;;  %v181_v51 = vadd.f32 %v173_v43, %v129_v37 }
  0xb1   :  { %v172_v29 = vmul.f32 %v559_v46, %v144_v7 }
  0xb3   :  { %v180_v38 = vadd.f32 %v172_v29, %v128_v32  ;;  %v280_v8 = vpop.permute.xlu0 %279 }
  0xb5   :  { %v217_v12 = vpop.permute.xlu1 %216  ;;  %v236_v48 = vadd.f32 %v207_v31, %v180_v38 }
  0xb6   :  { %v238_v15 = vadd.f32 %v217_v12, %v182_v14 }
  0xb7   :  { %v244_v55 = vmax.f32 %v236_v48, 0.0 }
  0xb8   :  { %v246_v19 = vmax.f32 %v238_v15, 0.0 }
  0xb9   :  { %v222_v17 = vpop.permute.xlu1 %221 }
  0xba   :  { %v239_v18 = vadd.f32 %v222_v17, %v183_v16 }
  0xbc   :  { %v247_v20 = vmax.f32 %v239_v18, 0.0 }
  0xbd   :  { %v38_v21 = vpop.permute.xlu1 %37 }
  0xbe   :  { %v256_v22 = vpack.c.bf16 %v247_v20, %v246_v19  ;;  %v75_v35 = vmul.f32 %v555_v41, %v38_v21 }
  0xc0   :  { %413 = vmatprep.subr.bf16.mxu0 %v256_v22  ;;  %v127_v44 = vadd.f32 %v119_v36, %v75_v35 }
  0xc1   :  { %414 = vmatpush3.bf16.msra.mxu0 %v256_v22 }
  0xc2   :  { %v84_v23 = vpop.permute.xlu1 %83 }
  0xc3   :  { %v118_v45 = vmul.f32 %v553_v39, %v84_v23 }
  0xc5   :  { %v126_v52 = vadd.f32 %v118_v45, %v74_v47 }
  0xc7   :  { %v136_v30 = vpop.permute.xlu1 %135 }
  0xc8   :  { %v170_v49 = vmul.f32 %v559_v46, %v136_v30 }
  0xca   :  { %v178_v58 = vadd.f32 %v170_v49, %v126_v52 }
  0xcb   :  { %v140_v40 = vpop.permute.xlu1 %139 }
  0xcc   :  { %v171_v42 = vmul.f32 %v559_v46, %v140_v40  ;;  %v443_v46 = vld [vmem:[%s656_s3 + $0x8] sm:$0xff]  }
  0xce   :  { %v179_v50 = vadd.f32 %v171_v42, %v127_v44 }
  0xd0   :  { %v212_v34 = vpop.permute.xlu1 %211  ;;  %v235_v56 = vadd.f32 %v202_v54, %v179_v50 }
  0xd1   :  { %v237_v53 = vadd.f32 %v212_v34, %v181_v51 }
  0xd2   :  { %v243_v39 = vmax.f32 %v235_v56, 0.0 }
  0xd3   :  { %v245_v57 = vmax.f32 %v237_v53, 0.0 }
  0xd4   :  { %v197_v59 = vpop.permute.xlu1 %196 }
  0xd5   :  { %v255_v28 = vpack.c.bf16 %v245_v57, %v244_v55  ;;  %v234_v60 = vadd.f32 %v197_v59, %v178_v58 }
  0xd7   :  { %v242_v61 = vmax.f32 %v234_v60, 0.0  ;;  %415 = vmatprep.subr.bf16.mxu0 %v255_v28 }
  0xd8   :  { %416 = vmatpush3.bf16.msra.mxu0 %v255_v28  ;;  %v265_v63 = vpop.permute.xlu1 %264 }
  0xd9   :  { %v254_v41 = vpack.c.bf16 %v243_v39, %v242_v61 }
  0xdb   :  { %417 = vmatprep.subr.bf16.mxu0 %v254_v41 }
  0xdc   :  { %418 = vmatpush3.bf16.msra.mxu0 %v254_v41  ;;  %v275_v6 = vpop.permute.xlu1 %274 }
  0xdf   :  { %420 = vmatmul.mubr.msk.bf16.vlgmr.msra.gmra.mxu0 %vm292_vm0, %v443_v46 }
 0x19f   :  { %v421_v62 = vpop.f32.mrf.mxu0 }
 0x1a0   :  { %v342_v7 = vadd.f32 %v421_v62, %v275_v6 }
 0x1a1   :  { %v333_v0 = vpop.f32.mrf.mxu0 }
 0x1a2   :  { %v334_v1 = vadd.f32 %v333_v0, %v265_v63 }
 0x1a3   :  { %v422_v2 = vpop.f32.mrf.mxu0 }
 0x1a4   :  { %348 = vxpose.xlu1.b32.start [1/4] (short) %v334_v1, 128  ;;  %v345_v9 = vadd.f32 %v422_v2, %v280_v8 }
 0x1a5   :  { %v336_v4 = vpop.f32.mrf.mxu0 }
 0x1a6   :  { %v337_v5 = vadd.f32 %v336_v4, %v270_v3 }
 0x1a8   :  { %349 = vxpose.xlu1.b32.cont [2/4] (short) %v337_v5, 128 }
 0x1ac   :  { %350 = vxpose.xlu1.b32.cont [3/4] (short) %v342_v7, 128 }
 0x1b0   :  { %351 = vxpose.xlu1.b32.end [4/4] (short) %v345_v9, 128 }
 0x220   :  { %v364_v10 = vpop.trf.xlu1 }
 0x221   :  { %381 = vst.msk [vmem:[%s658_s5] sm:$0xff] %vm380_vm1, %v364_v10 }
 0x224   :  { %v365_v11 = vpop.trf.xlu1 }
 0x225   :  { %382 = vst.msk [vmem:[%s658_s5 + $0x8] sm:$0xff] %vm380_vm1, %v365_v11 }
 0x228   :  { %v366_v12 = vpop.trf.xlu1 }
 0x229   :  { %383 = vst.msk [vmem:[%s658_s5 + $0x10] sm:$0xff] %vm380_vm1, %v366_v12 }
 0x22c   :  { %v367_v13 = vpop.trf.xlu1 }
 0x22d   :  { %384 = vst.msk [vmem:[%s658_s5 + $0x18] sm:$0xff] %vm380_vm1, %v367_v13 }
 0x230   :  { %v368_v14 = vpop.trf.xlu1 }
 0x231   :  { %385 = vst.msk [vmem:[%s658_s5 + $0x20] sm:$0xff] %vm380_vm1, %v368_v14 }
 0x234   :  { %v369_v15 = vpop.trf.xlu1 }
 0x235   :  { %386 = vst.msk [vmem:[%s658_s5 + $0x28] sm:$0xff] %vm380_vm1, %v369_v15 }
 0x238   :  { %v370_v16 = vpop.trf.xlu1 }
 0x239   :  { %387 = vst.msk [vmem:[%s658_s5 + $0x30] sm:$0xff] %vm380_vm1, %v370_v16 }
 0x23c   :  { %v371_v17 = vpop.trf.xlu1 }
 0x23d   :  { %388 = vst.msk [vmem:[%s658_s5 + $0x38] sm:$0xff] %vm380_vm1, %v371_v17 }
 0x240   :  { %v372_v18 = vpop.trf.xlu1 }
 0x241   :  { %389 = vst.msk [vmem:[%s658_s5 + $0x40] sm:$0xff] %vm380_vm1, %v372_v18 }
 0x244   :  { %v373_v19 = vpop.trf.xlu1 }
 0x245   :  { %390 = vst.msk [vmem:[%s658_s5 + $0x48] sm:$0xff] %vm380_vm1, %v373_v19 }
 0x248   :  { %v374_v20 = vpop.trf.xlu1 }
 0x249   :  { %391 = vst.msk [vmem:[%s658_s5 + $0x50] sm:$0xff] %vm380_vm1, %v374_v20 }
 0x24c   :  { %v375_v21 = vpop.trf.xlu1 }
 0x24d   :  { %392 = vst.msk [vmem:[%s658_s5 + $0x58] sm:$0xff] %vm380_vm1, %v375_v21 }
 0x250   :  { %v376_v22 = vpop.trf.xlu1 }
 0x251   :  { %393 = vst.msk [vmem:[%s658_s5 + $0x60] sm:$0xff] %vm380_vm1, %v376_v22 }
 0x254   :  { %v377_v23 = vpop.trf.xlu1 }
 0x255   :  { %394 = vst.msk [vmem:[%s658_s5 + $0x68] sm:$0xff] %vm380_vm1, %v377_v23 }
 0x258   :  { %v378_v24 = vpop.trf.xlu1 }
 0x259   :  { %395 = vst.msk [vmem:[%s658_s5 + $0x70] sm:$0xff] %vm380_vm1, %v378_v24 }
 0x25c   :  { %v379_v25 = vpop.trf.xlu1 }
 0x25d   :  { %396 = vst.msk [vmem:[%s658_s5 + $0x78] sm:$0xff] %vm380_vm1, %v379_v25 }

</bundles_post_ra>
